<compile_context>
chip_gen: v6e
topology: v6e:2x2x1
jax: 0.10.0
libtpu: 0.0.40
codegen_flags: <defaults>
</compile_context>

<pallas_src>
import jax
import jax.numpy as jnp
from jax.experimental import pallas as pl
from jax.experimental.pallas import tpu as pltpu


def _layer_scale_kernel(x_ref, g_ref, o_ref):
    # x_ref: (tile_rows, lane) tile in VMEM; g_ref: (1, lane) fp32 in VMEM.
    # Pure VPU elementwise multiply, gamma broadcast over the row (sublane) axis.
    x = x_ref[...].astype(jnp.float32)
    o_ref[...] = (x * g_ref[...]).astype(o_ref.dtype)


def layer_scale(x: jax.Array, gamma: jax.Array, *, inplace: bool = False) -> jax.Array:
    """x: (..., D), gamma: (D,). Returns x * gamma (broadcast over last dim)."""
    orig_shape = x.shape
    D = orig_shape[-1]
    assert gamma.shape == (D,), f"gamma shape {gamma.shape} != ({D},)"

    itemsize = jnp.dtype(x.dtype).itemsize
    total = 1
    for s in orig_shape:
        total *= s

    # ---- Choose a lane-dense last dim for the kernel view -------------------
    if D % 128 == 0:
        lane = D                     # already lane-dense
    elif (128 % D == 0) and (total % 128 == 0):
        lane = 128                   # fold 128//D channel vectors per lane row
    else:
        lane = D                     # correct fallback; tail lanes use masked vst
        # TODO(synk): pad D to a multiple of 128 in the caller for fully
        # unmasked stores when D is neither a divisor nor a multiple of 128.
    reps = lane // D

    rows = total // lane
    x2d = x.reshape(rows, lane)
    # gamma kept in fp32 (like the PyTorch parameter); tiled to match the fold.
    gamma_slab = jnp.tile(gamma.astype(jnp.float32), reps).reshape(1, lane)

    # ---- Row tiling: ~4 MiB per block, multiple of 8 rows -------------------
    MAX_BLOCK_BYTES = 4 * 1024 * 1024
    rows_per_block = max(8, (MAX_BLOCK_BYTES // (lane * itemsize)) // 8 * 8)
    tile_rows = min(rows, rows_per_block)   # full-extent block if rows are few
    num_tiles = pl.cdiv(rows, tile_rows)

    # VMEM needed: double-buffered input + output blocks + resident gamma.
    block_bytes = tile_rows * lane * itemsize
    vmem_need = 4 * block_bytes + 2 * lane * 4 + (1 << 20)   # + 1 MiB slack
    vmem_limit = min(max(vmem_need, 16 << 20), 32 << 20)     # safe on v5e/v6e/v7x

    cost = pl.CostEstimate(
        flops=total,
        transcendentals=0,
        bytes_accessed=2 * total * itemsize + lane * 4,
    )

    out2d = pl.pallas_call(
        _layer_scale_kernel,
        out_shape=jax.ShapeDtypeStruct((rows, lane), x.dtype),
        grid_spec=pltpu.PrefetchScalarGridSpec(
            num_scalar_prefetch=0,
            grid=(num_tiles,),
            in_specs=[
                pl.BlockSpec((tile_rows, lane), lambda i: (i, 0)),
                # Constant index_map: gamma is DMA'd once and stays resident.
                pl.BlockSpec((1, lane), lambda i: (0, 0)),
            ],
            out_specs=pl.BlockSpec((tile_rows, lane), lambda i: (i, 0)),
        ),
        compiler_params=pltpu.CompilerParams(
            dimension_semantics=("parallel",),
            vmem_limit_bytes=vmem_limit,
        ),
        cost_estimate=cost,
        input_output_aliases=({0: 0} if inplace else {}),
    )(x2d, gamma_slab)

    return out2d.reshape(orig_shape)


class LayerScale:
    """Deterministic parameter setup mirroring the PyTorch module __init__."""

    def __init__(self, dim: int, init_values: float = 1e-5, inplace: bool = False):
        self.inplace = inplace
        self.gamma = init_values * jnp.ones((dim,), dtype=jnp.float32)

    def __call__(self, x: jax.Array) -> jax.Array:
        return layer_scale(x, self.gamma, inplace=self.inplace)


if __name__ == "__main__":
    key = jax.random.PRNGKey(0)
    B, N, D = 2, 8, 32  # batch, seq, hidden
    x = jax.random.normal(key, (B, N, D), dtype=jnp.float32)

    module = LayerScale(dim=D, init_values=1e-5)
    out = module(x)
    out = jax.block_until_ready(out)

    # Reference check against plain-JAX semantics of x * gamma.
    ref = x * module.gamma
    assert out.shape == x.shape and out.dtype == x.dtype
    assert jnp.allclose(out, ref, atol=1e-6, rtol=1e-6)

    # Also exercise the inplace-aliased path (same math, aliased buffers).
    out_inplace = jax.block_until_ready(layer_scale(x, module.gamma, inplace=True))
    assert jnp.allclose(out_inplace, ref, atol=1e-6, rtol=1e-6)

    print("KERNEL_OK")
</pallas_src>

<mosaic_0001>
module attributes {stable_mosaic.version = 11 : i64} {
  func.func @_layer_scale_kernel(%arg0: i32, %arg1: memref<4x128xf32, #tpu.memory_space<vmem>>, %arg2: memref<1x128xf32, #tpu.memory_space<vmem>>, %arg3: memref<4x128xf32, #tpu.memory_space<vmem>>) attributes {dimension_semantics = [#tpu.dimension_semantics<parallel>], iteration_bounds = array<i64: 1>, scalar_prefetch = 0 : i64, scratch_operands = 0 : i64, tpu.core_type = #tpu.core_type<tc>, window_params = [{transform_indices = @transform_0, window_bounds = array<i64: 4, 128>}, {pipeline_mode = #tpu.pipeline_mode<synchronous>, transform_indices = @transform_1, window_bounds = array<i64: 1, 128>}, {transform_indices = @transform_2, window_bounds = array<i64: 4, 128>}]} {
    %c0 = arith.constant 0 : index
    %c0_0 = arith.constant 0 : index
    %0 = vector.load %arg1[%c0, %c0_0] : memref<4x128xf32, #tpu.memory_space<vmem>>, vector<4x128xf32>
    %c0_1 = arith.constant 0 : index
    %c0_2 = arith.constant 0 : index
    %1 = vector.load %arg2[%c0_1, %c0_2] : memref<1x128xf32, #tpu.memory_space<vmem>>, vector<1x128xf32>
    %2 = vector.broadcast %1 : vector<1x128xf32> to vector<4x128xf32>
    %3 = arith.mulf %0, %2 : vector<4x128xf32>
    %c0_3 = arith.constant 0 : index
    %c0_4 = arith.constant 0 : index
    %4 = vector.load %arg3[%c0_3, %c0_4] : memref<4x128xf32, #tpu.memory_space<vmem>>, vector<4x128xf32>
    tpu.vector_store %arg3[%c0_3, %c0_4], %3 {strides = array<i32>} : memref<4x128xf32, #tpu.memory_space<vmem>>, vector<4x128xf32>,
    return
  }
  func.func @transform_0(%arg0: i32) -> (i32, i32) {
    %c0_i32 = arith.constant 0 : i32
    %c0_i32_0 = arith.constant 0 : i32
    return %arg0, %c0_i32 : i32, i32
  }
  func.func @transform_1(%arg0: i32) -> (i32, i32) {
    %c0_i32 = arith.constant 0 : i32
    %c0_i32_0 = arith.constant 0 : i32
    %c0_i32_1 = arith.constant 0 : i32
    return %c0_i32, %c0_i32_0 : i32, i32
  }
  func.func @transform_2(%arg0: i32) -> (i32, i32) {
    %c0_i32 = arith.constant 0 : i32
    %c0_i32_0 = arith.constant 0 : i32
    return %arg0, %c0_i32 : i32, i32
  }
}

</mosaic_0001>

<bundles_post_ra>
// kernel: tpu_custom_call.1
= control target key start
LH: loop header
LB: loop body
LE: loop exit
PB: predicated region body
PF: predicated region fallthrough
CT: control target
= control target key end

     0   :  { %7 = vsyncpa [#allocation3], 0  ;;  %s122_s0 = inlined_call_operand.hbm [shape: f32[4,128], index: 0, kind: input, shape index: {}]   ;;  %s123_s1 = inlined_call_operand.vmem [shape: f32[1,128], index: 1, kind: input, shape index: {}]   ;;  %s124_s2 = inlined_call_operand.hbm [shape: f32[4,128], index: 2, kind: output, shape index: {}]  }
   0x1   :  { %8 = vsyncpa [#allocation4], 0  ;;  %s96_s9 = smov [#allocation2]  }
   0x2   :  { %s15_s10 = sshll.u32 %s96_s9, 4  ;;  %s16_s10 = int_to_ptr.vmem [resolvable:$true] %s15_s10 }
   0x3   :  { %s60_s11 = scalar_lea.vmem %s16_s10, 64  ;;  %p65_p1 = scmp.lt.s32.totalorder %s16_s10, %s16_s10 }
   0x4   :  { %p61_p0 = scmp.ne.s32.totalorder %s16_s10, %s60_s11  ;;  %p66_p2 = scmp.lt.s32.totalorder %s60_s11, %s60_s11 }
   0x6   :  { %p67_p3 = por %p66_p2, %p65_p1 }
   0x8   :  { %p68_p4 = pnand %p67_p3, %p61_p0 }
   0xa   :  { %71 = shalt.err (!%p68_p4)
}
   0xb   :  { %18 = dma.hbm_to_vmem [thread:$0]  %s122_s0, 64, %s16_s10, [#allocation3]  }
   0xc   :  { %92 = dma.done.wait [#allocation3], 64  }
   0xd   :  { %93 = vsyncadd [#allocation3], 4294967232  ;;  %s97_s14 = smov [#allocation5]   ;;  %v24_v0 = vld [vmem:[#allocation2] sm:$0xf] }
   0xe   :  { %s40_s15 = sshll.u32 %s97_s14, 4  ;;  %v49_v1 = vld [vmem:[%s123_s1] ss:$0 sm:$0xff]  ;;  %s41_s15 = int_to_ptr.vmem [resolvable:$true] %s40_s15 }
   0xf   :  { %v32_v2 = vmul.f32 %v49_v1, %v24_v0  ;;  %s72_s18 = scalar_lea.vmem %s41_s15, 64  ;;  %p77_p6 = scmp.lt.s32.totalorder %s41_s15, %s41_s15 }
  0x10   :  { %p73_p5 = scmp.ne.s32.totalorder %s41_s15, %s72_s18  ;;  %p78_p7 = scmp.lt.s32.totalorder %s72_s18, %s72_s18 }
  0x11   :  { %33 = vst [vmem:[#allocation5] sm:$0xf] %v32_v2 }
  0x12   :  { %p79_p8 = por %p78_p7, %p77_p6 }
  0x14   :  { %p80_p9 = pnand %p79_p8, %p73_p5 }
  0x16   :  { %83 = shalt.err (!%p80_p9)
}
  0x17   :  { %43 = dma.vmem_to_hbm [thread:$0]  %s41_s15, 64, %s124_s2, [#allocation4]  }
  0x18   :  { %94 = dma.done.wait [#allocation4], 64  }
  0x19   :  { %95 = vsyncadd [#allocation4], 4294967232 }
  0x1a   :  { %47 = vsyncpa [#allocation3], 1 }
  0x1b   :  { %48 = vsyncpa [#allocation4], 1 }

</bundles_post_ra>
